<compile_context>
chip_gen: v7x
topology: tpu7x:2x2x1
jax: 0.10.0
libtpu: 0.0.40
codegen_flags: <defaults>
</compile_context>

<pallas_src>
import jax
import jax.numpy as jnp
from jax.experimental import pallas as pl
from jax.experimental.pallas import tpu as pltpu


def _round_up(x, m):
    return (x + m - 1) // m * m


def linear_interp_taps(n_in, n_out):
    """Left/right neighbour indices + right weight reproducing
    F.interpolate(mode='linear', align_corners=False) along the last axis."""
    i = jnp.arange(n_out, dtype=jnp.float32)
    src = (i + 0.5) * (n_in / n_out) - 0.5
    src = jnp.maximum(src, 0.0)                        # PyTorch clamps negatives to 0
    i0 = jnp.minimum(jnp.floor(src).astype(jnp.int32), n_in - 1)
    i1 = jnp.minimum(i0 + 1, n_in - 1)
    w = src - i0.astype(jnp.float32)
    return i0, i1, w


def fp_upsample_kernel(ip_ref, ps_ref, w1p_ref, w1s_ref, b1_ref, w2_ref, b2_ref,
                       out_ref):
    # Activations arrive lane-dense as (C, tn) tiles.  Cast to bf16 right
    # before the MXU (skip features stream in as f32; interp may already be
    # bf16 from the fused host gather/lerp — astype is then a no-op).
    interp = ip_ref[...].astype(jnp.bfloat16)          # (C_prev, tn)
    skip = ps_ref[...].astype(jnp.bfloat16)            # (C_skip, tn)

    # Conv1d(k=1) over concat([interp, skip]) == W1p@interp + W1s@skip.
    # BN1 scale is pre-folded into W1p/W1s; only the shift + ReLU remain.
    h = (jnp.dot(w1p_ref[...], interp, preferred_element_type=jnp.float32)
         + jnp.dot(w1s_ref[...], skip, preferred_element_type=jnp.float32))
    h = jnp.maximum(h + b1_ref[...], 0.0).astype(jnp.bfloat16)

    # Second Conv1d(k=1) (BN2 scale folded) + shift + ReLU.
    o = jnp.dot(w2_ref[...], h, preferred_element_type=jnp.float32)
    o = jnp.maximum(o + b2_ref[...], 0.0)
    out_ref[...] = o.astype(out_ref.dtype)


def feature_propagation_upsample(xyz_prev, xyz_skip, points_prev, points_skip,
                                 params, *, tile_n=4096, out_dtype=None,
                                 vmem_budget_bytes=None, core_parallel=False):
    """points_prev: (B, C_prev, N_prev); points_skip: (B, C_skip, N_skip).
    Returns (B, C_out, N_skip).  xyz_* only supply the target point count
    (the PyTorch module never uses the coordinates).

    core_parallel=True shards the lane-tile grid axis across v7x's two
    TensorCores (leave False on single-core v5e/v6e)."""
    B, C_prev, N_prev = points_prev.shape
    _, C_skip, N_skip = points_skip.shape
    assert xyz_skip.shape[1] == N_skip and xyz_prev.shape[1] == N_prev
    W1p, W1s, b1, W2, b2 = params
    C_out = W2.shape[0]
    out_dtype = points_skip.dtype if out_dtype is None else out_dtype

    # ---- host-side prep -----------------------------------------------------
    if N_prev == N_skip:
        # PyTorch branch: no interpolation.  Stream points_prev as-is (f32);
        # the kernel casts to bf16 next to the matmul.
        interp = points_prev
    else:
        # 2-tap lerp folded into the (unavoidable) neighbour gather; the bf16
        # cast fuses with the gather/lerp, so the kernel reads one slab only.
        i0, i1, w = linear_interp_taps(N_prev, N_skip)
        p0 = jnp.take(points_prev, i0, axis=2)          # (B, C_prev, N_skip)
        p1 = jnp.take(points_prev, i1, axis=2)          # (B, C_prev, N_skip)
        interp = (p0 + w[None, None, :] * (p1 - p0)).astype(jnp.bfloat16)

    # ---- lane tile: biggest multiple of 128 that fits the VMEM budget -------
    if vmem_budget_bytes is None:
        try:
            vmem_cap = pltpu.get_tpu_info().vmem_capacity_bytes
        except Exception:
            vmem_cap = 64 * 1024 * 1024                 # conservative (v7x floor)
        vmem_budget_bytes = min(vmem_cap // 2, 64 * 1024 * 1024)
    weight_bytes = sum(int(a.size) * a.dtype.itemsize for a in (W1p, W1s, b1, W2, b2))
    per_col = 2 * (C_prev * interp.dtype.itemsize          # double-buffered streams
                   + C_skip * points_skip.dtype.itemsize
                   + C_out * jnp.dtype(out_dtype).itemsize)
    tn = (vmem_budget_bytes - 2 * weight_bytes) // per_col
    tn = max(128, (min(tn, tile_n, _round_up(N_skip, 128)) // 128) * 128)

    N_pad = _round_up(N_skip, tn)
    if N_pad != N_skip:
        pad = ((0, 0), (0, 0), (0, N_pad - N_skip))
        interp = jnp.pad(interp, pad)
        points_skip = jnp.pad(points_skip, pad)

    grid = (B, N_pad // tn)
    # Squeezed batch dim: the kernel still sees lane-dense (C, tn) tiles, but
    # no host-side transpose/reshape round trip is needed on either side.
    act_spec = lambda c: pl.BlockSpec((pl.Squeezed(), c, tn), lambda b, i: (b, 0, i))
    const_spec = lambda shape: pl.BlockSpec(shape, lambda b, i: (0, 0))
    # TODO(synk): pipeline_mode=pl.Buffered(1) on the constant weight specs
    # would drop their second buffer (only matters at very large C_out).

    lane_sem = pltpu.CORE_PARALLEL if core_parallel else "parallel"

    out = pl.pallas_call(
        fp_upsample_kernel,
        out_shape=jax.ShapeDtypeStruct((B, C_out, N_pad), out_dtype),
        grid=grid,
        in_specs=[
            act_spec(C_prev),           # interpolated prev features (single slab)
            act_spec(C_skip),           # skip features (f32, cast in kernel)
            const_spec(W1p.shape),      # W1 prev cols (BN1 scale folded), bf16
            const_spec(W1s.shape),      # W1 skip cols (BN1 scale folded), bf16
            const_spec(b1.shape),       # BN1 shift, f32
            const_spec(W2.shape),       # W2 (BN2 scale folded), bf16
            const_spec(b2.shape),       # BN2 shift, f32
        ],
        out_specs=act_spec(C_out),
        compiler_params=pltpu.CompilerParams(
            dimension_semantics=("parallel", lane_sem),
            vmem_limit_bytes=int(max(32 * 1024 * 1024, vmem_budget_bytes)),
        ),
    )(interp, points_skip, W1p, W1s, b1, W2, b2)

    return out if N_pad == N_skip else out[:, :, :N_skip]


def make_params(key, c_prev, c_skip, c_out, eps=1e-5):
    """Returns (raw, folded).  `raw` mimics the PyTorch module's parameters /
    running stats; `folded` is what the kernel consumes (BN scale folded into
    conv weights, bf16 matmul operands, f32 shifts)."""
    ks = jax.random.split(key, 8)
    c_in = c_prev + c_skip
    w1 = jax.random.normal(ks[0], (c_out, c_in), jnp.float32) * 0.1   # Conv1d k=1, bias=False
    w2 = jax.random.normal(ks[1], (c_out, c_out), jnp.float32) * 0.1
    g1 = 1.0 + 0.1 * jax.random.normal(ks[2], (c_out,), jnp.float32)
    be1 = 0.1 * jax.random.normal(ks[3], (c_out,), jnp.float32)
    mu1 = 0.1 * jax.random.normal(ks[4], (c_out,), jnp.float32)
    var1 = jnp.abs(jax.random.normal(ks[5], (c_out,), jnp.float32)) + 0.5
    g2 = 1.0 + 0.1 * jax.random.normal(ks[6], (c_out,), jnp.float32)
    be2 = 0.1 * jax.random.normal(ks[7], (c_out,), jnp.float32)
    mu2 = jnp.zeros((c_out,), jnp.float32)
    var2 = jnp.ones((c_out,), jnp.float32)
    raw = (w1, g1, be1, mu1, var1, w2, g2, be2, mu2, var2)

    # Fold BN (eval mode) into the conv weights: relu(s*(Wx)+b) == relu((sW)x+b).
    sc1 = g1 / jnp.sqrt(var1 + eps)
    sh1 = be1 - mu1 * sc1
    sc2 = g2 / jnp.sqrt(var2 + eps)
    sh2 = be2 - mu2 * sc2
    w1f = w1 * sc1[:, None]
    w2f = w2 * sc2[:, None]
    folded = (w1f[:, :c_prev].astype(jnp.bfloat16),
              w1f[:, c_prev:].astype(jnp.bfloat16),
              sh1.reshape(c_out, 1).astype(jnp.float32),
              w2f.astype(jnp.bfloat16),
              sh2.reshape(c_out, 1).astype(jnp.float32))
    return raw, folded


def reference(points_prev, points_skip, raw, n_skip, eps=1e-5):
    """Pure-JAX f32 re-implementation of the PyTorch forward (eval-mode BN)."""
    w1, g1, be1, mu1, var1, w2, g2, be2, mu2, var2 = raw
    n_prev = points_prev.shape[2]
    if n_prev != n_skip:
        i0, i1, w = linear_interp_taps(n_prev, n_skip)
        p0 = jnp.take(points_prev, i0, axis=2)
        p1 = jnp.take(points_prev, i1, axis=2)
        interp = p0 + w[None, None, :] * (p1 - p0)
    else:
        interp = points_prev
    x = jnp.concatenate([interp, points_skip], axis=1)

    def bn(y, g, b, mu, var):
        return ((y - mu[None, :, None]) / jnp.sqrt(var + eps)[None, :, None]
                * g[None, :, None] + b[None, :, None])

    h = jnp.einsum('oc,bcn->bon', w1, x)
    h = jnp.maximum(bn(h, g1, be1, mu1, var1), 0.0)
    o = jnp.einsum('oc,bcn->bon', w2, h)
    o = jnp.maximum(bn(o, g2, be2, mu2, var2), 0.0)
    return o


if __name__ == "__main__":
    B, C_prev, C_skip, C_out = 2, 16, 8, 32
    N_prev, N_skip = 128, 256

    key = jax.random.PRNGKey(0)
    k_xyz_p, k_xyz_s, k_fp, k_fs, k_par, k_fp2 = jax.random.split(key, 6)

    xyz_prev = jax.random.normal(k_xyz_p, (B, N_prev, 3), jnp.float32)
    xyz_skip = jax.random.normal(k_xyz_s, (B, N_skip, 3), jnp.float32)
    points_prev = jax.random.normal(k_fp, (B, C_prev, N_prev), jnp.float32)
    points_skip = jax.random.normal(k_fs, (B, C_skip, N_skip), jnp.float32)

    raw, folded = make_params(k_par, C_prev, C_skip, C_out)

    # tile_n=128 exercises the multi-step (batch x lane-tile) grid at this toy
    # size; production sizes use the VMEM-budget auto tile (cap 4096 by default).
    out = feature_propagation_upsample(xyz_prev, xyz_skip, points_prev,
                                       points_skip, folded, tile_n=128)
    out = jax.block_until_ready(out)
    ref = reference(points_prev, points_skip, raw, N_skip)
    assert out.shape == (B, C_out, N_skip)
    # bf16 matmul operands (f32 accumulation) vs. full-f32 reference.
    max_err = float(jnp.max(jnp.abs(out.astype(jnp.float32) - ref)))
    assert max_err < 5e-2, max_err

    # Also exercise the N_prev == N_skip fast path (identity interpolation).
    points_prev_same = jax.random.normal(k_fp2, (B, C_prev, N_skip), jnp.float32)
    out2 = feature_propagation_upsample(xyz_skip, xyz_skip, points_prev_same,
                                        points_skip, folded, tile_n=128)
    out2 = jax.block_until_ready(out2)
    ref2 = reference(points_prev_same, points_skip, raw, N_skip)
    max_err2 = float(jnp.max(jnp.abs(out2.astype(jnp.float32) - ref2)))
    assert out2.shape == (B, C_out, N_skip)
    assert max_err2 < 5e-2, max_err2

    print("KERNEL_OK")
</pallas_src>

<mosaic_0001>
module attributes {stable_mosaic.version = 11 : i64} {
  func.func @fp_upsample_kernel(%arg0: i32, %arg1: i32, %arg2: memref<1x16x128xbf16, #tpu.memory_space<vmem>>, %arg3: memref<1x8x128xf32, #tpu.memory_space<vmem>>, %arg4: memref<32x16xbf16, #tpu.memory_space<vmem>>, %arg5: memref<32x8xbf16, #tpu.memory_space<vmem>>, %arg6: memref<32x1xf32, #tpu.memory_space<vmem>>, %arg7: memref<32x32xbf16, #tpu.memory_space<vmem>>, %arg8: memref<32x1xf32, #tpu.memory_space<vmem>>, %arg9: memref<1x32x128xf32, #tpu.memory_space<vmem>>) attributes {dimension_semantics = [#tpu.dimension_semantics<parallel>, #tpu.dimension_semantics<parallel>], iteration_bounds = array<i64: 2, 2>, scalar_prefetch = 0 : i64, scratch_operands = 0 : i64, tpu.core_type = #tpu.core_type<tc>, window_params = [{transform_indices = @transform_0, window_bounds = array<i64: 1, 16, 128>}, {transform_indices = @transform_1, window_bounds = array<i64: 1, 8, 128>}, {pipeline_mode = #tpu.pipeline_mode<synchronous>, transform_indices = @transform_2, window_bounds = array<i64: 32, 16>}, {pipeline_mode = #tpu.pipeline_mode<synchronous>, transform_indices = @transform_3, window_bounds = array<i64: 32, 8>}, {pipeline_mode = #tpu.pipeline_mode<synchronous>, transform_indices = @transform_4, window_bounds = array<i64: 32, 1>}, {pipeline_mode = #tpu.pipeline_mode<synchronous>, transform_indices = @transform_5, window_bounds = array<i64: 32, 32>}, {pipeline_mode = #tpu.pipeline_mode<synchronous>, transform_indices = @transform_6, window_bounds = array<i64: 32, 1>}, {transform_indices = @transform_7, window_bounds = array<i64: 1, 32, 128>}]} {
    %c0 = arith.constant 0 : index
    %c0_0 = arith.constant 0 : index
    %c0_1 = arith.constant 0 : index
    %0 = vector.load %arg2[%c0, %c0_0, %c0_1] : memref<1x16x128xbf16, #tpu.memory_space<vmem>>, vector<1x16x128xbf16>
    %1 = vector.shape_cast %0 : vector<1x16x128xbf16> to vector<16x128xbf16>
    %c0_2 = arith.constant 0 : index
    %c0_3 = arith.constant 0 : index
    %c0_4 = arith.constant 0 : index
    %2 = vector.load %arg3[%c0_2, %c0_3, %c0_4] : memref<1x8x128xf32, #tpu.memory_space<vmem>>, vector<1x8x128xf32>
    %3 = vector.shape_cast %2 : vector<1x8x128xf32> to vector<8x128xf32>
    %4 = arith.truncf %3 : vector<8x128xf32> to vector<8x128xbf16>
    %c0_5 = arith.constant 0 : index
    %c0_6 = arith.constant 0 : index
    %5 = vector.load %arg4[%c0_5, %c0_6] : memref<32x16xbf16, #tpu.memory_space<vmem>>, vector<32x16xbf16>
    %cst = arith.constant dense<0.000000e+00> : vector<32x128xf32>
    %6 = tpu.matmul %5, %1, %cst {dimension_numbers = #tpu.dot_dimension_numbers<[1], [0], [0], [1], [0, 0, 1, 1], [], []>} : vector<32x16xbf16>, vector<16x128xbf16>, vector<32x128xf32> -> vector<32x128xf32>
    %c0_7 = arith.constant 0 : index
    %c0_8 = arith.constant 0 : index
    %7 = vector.load %arg5[%c0_7, %c0_8] : memref<32x8xbf16, #tpu.memory_space<vmem>>, vector<32x8xbf16>
    %cst_9 = arith.constant dense<0.000000e+00> : vector<32x128xf32>
    %8 = tpu.matmul %7, %4, %cst_9 {dimension_numbers = #tpu.dot_dimension_numbers<[1], [0], [0], [1], [0, 0, 1, 1], [], []>} : vector<32x8xbf16>, vector<8x128xbf16>, vector<32x128xf32> -> vector<32x128xf32>
    %9 = arith.addf %6, %8 : vector<32x128xf32>
    %c0_10 = arith.constant 0 : index
    %c0_11 = arith.constant 0 : index
    %10 = vector.load %arg6[%c0_10, %c0_11] : memref<32x1xf32, #tpu.memory_space<vmem>>, vector<32x1xf32>
    %11 = vector.broadcast %10 : vector<32x1xf32> to vector<32x128xf32>
    %12 = arith.addf %9, %11 : vector<32x128xf32>
    %cst_12 = arith.constant 0.000000e+00 : f32
    %13 = vector.broadcast %cst_12 : f32 to vector<32x128xf32>
    %14 = arith.maximumf %12, %13 : vector<32x128xf32>
    %15 = arith.truncf %14 : vector<32x128xf32> to vector<32x128xbf16>
    %c0_13 = arith.constant 0 : index
    %c0_14 = arith.constant 0 : index
    %16 = vector.load %arg7[%c0_13, %c0_14] : memref<32x32xbf16, #tpu.memory_space<vmem>>, vector<32x32xbf16>
    %cst_15 = arith.constant dense<0.000000e+00> : vector<32x128xf32>
    %17 = tpu.matmul %16, %15, %cst_15 {dimension_numbers = #tpu.dot_dimension_numbers<[1], [0], [0], [1], [0, 0, 1, 1], [], []>} : vector<32x32xbf16>, vector<32x128xbf16>, vector<32x128xf32> -> vector<32x128xf32>
    %c0_16 = arith.constant 0 : index
    %c0_17 = arith.constant 0 : index
    %18 = vector.load %arg8[%c0_16, %c0_17] : memref<32x1xf32, #tpu.memory_space<vmem>>, vector<32x1xf32>
    %19 = vector.broadcast %18 : vector<32x1xf32> to vector<32x128xf32>
    %20 = arith.addf %17, %19 : vector<32x128xf32>
    %cst_18 = arith.constant 0.000000e+00 : f32
    %21 = vector.broadcast %cst_18 : f32 to vector<32x128xf32>
    %22 = arith.maximumf %20, %21 : vector<32x128xf32>
    %c0_19 = arith.constant 0 : index
    %c0_20 = arith.constant 0 : index
    %c0_21 = arith.constant 0 : index
    %23 = vector.load %arg9[%c0_19, %c0_20, %c0_21] : memref<1x32x128xf32, #tpu.memory_space<vmem>>, vector<1x32x128xf32>
    %24 = vector.shape_cast %23 : vector<1x32x128xf32> to vector<32x128xf32>
    %25 = vector.shape_cast %22 : vector<32x128xf32> to vector<1x32x128xf32>
    tpu.vector_store %arg9[%c0_19, %c0_20, %c0_21], %25 {strides = array<i32>} : memref<1x32x128xf32, #tpu.memory_space<vmem>>, vector<1x32x128xf32>,
    return
  }
  func.func @transform_0(%arg0: i32, %arg1: i32) -> (i32, i32, i32) {
    %c0_i32 = arith.constant 0 : i32
    %c0_i32_0 = arith.constant 0 : i32
    return %arg0, %c0_i32, %arg1 : i32, i32, i32
  }
  func.func @transform_1(%arg0: i32, %arg1: i32) -> (i32, i32, i32) {
    %c0_i32 = arith.constant 0 : i32
    %c0_i32_0 = arith.constant 0 : i32
    return %arg0, %c0_i32, %arg1 : i32, i32, i32
  }
  func.func @transform_2(%arg0: i32, %arg1: i32) -> (i32, i32) {
    %c0_i32 = arith.constant 0 : i32
    %c0_i32_0 = arith.constant 0 : i32
    %c0_i32_1 = arith.constant 0 : i32
    return %c0_i32, %c0_i32_0 : i32, i32
  }
  func.func @transform_3(%arg0: i32, %arg1: i32) -> (i32, i32) {
    %c0_i32 = arith.constant 0 : i32
    %c0_i32_0 = arith.constant 0 : i32
    %c0_i32_1 = arith.constant 0 : i32
    return %c0_i32, %c0_i32_0 : i32, i32
  }
  func.func @transform_4(%arg0: i32, %arg1: i32) -> (i32, i32) {
    %c0_i32 = arith.constant 0 : i32
    %c0_i32_0 = arith.constant 0 : i32
    %c0_i32_1 = arith.constant 0 : i32
    return %c0_i32, %c0_i32_0 : i32, i32
  }
  func.func @transform_5(%arg0: i32, %arg1: i32) -> (i32, i32) {
    %c0_i32 = arith.constant 0 : i32
    %c0_i32_0 = arith.constant 0 : i32
    %c0_i32_1 = arith.constant 0 : i32
    return %c0_i32, %c0_i32_0 : i32, i32
  }
  func.func @transform_6(%arg0: i32, %arg1: i32) -> (i32, i32) {
    %c0_i32 = arith.constant 0 : i32
    %c0_i32_0 = arith.constant 0 : i32
    %c0_i32_1 = arith.constant 0 : i32
    return %c0_i32, %c0_i32_0 : i32, i32
  }
  func.func @transform_7(%arg0: i32, %arg1: i32) -> (i32, i32, i32) {
    %c0_i32 = arith.constant 0 : i32
    %c0_i32_0 = arith.constant 0 : i32
    return %arg0, %c0_i32, %arg1 : i32, i32, i32
  }
}

</mosaic_0001>

<bundles_post_ra>
// kernel: tpu_custom_call.1
= control target key start
LH: loop header
LB: loop body
LE: loop exit
PB: predicated region body
PF: predicated region fallthrough
CT: control target
= control target key end

     0   :  { %s1272_s0 = inlined_call_operand.vmem [shape: bf16[2,16,256], index: 0, kind: input, shape index: {}]   ;;  %s1273_s1 = inlined_call_operand.vmem [shape: f32[2,8,256], index: 1, kind: input, shape index: {}]   ;;  %s1274_s2 = inlined_call_operand.vmem [shape: bf16[32,16], index: 2, kind: input, shape index: {}]   ;;  %s1275_s3 = inlined_call_operand.vmem [shape: bf16[32,8], index: 3, kind: input, shape index: {}]   ;;  %s1276_s4 = inlined_call_operand.vmem [shape: f32[32,1], index: 4, kind: input, shape index: {}]   ;;  %s1277_s5 = inlined_call_operand.vmem [shape: bf16[32,32], index: 5, kind: input, shape index: {}]   ;;  %s1278_s6 = inlined_call_operand.vmem [shape: f32[32,1], index: 6, kind: input, shape index: {}]   ;;  %s1279_s7 = inlined_call_operand.hbm [shape: f32[2,32,256], index: 7, kind: output, shape index: {}]  }
   0x1   :  { %1284 = sst [smem:[#allocation10_spill]] %s1272_s0 }
   0x2   :  { %12 = vsyncpa [#allocation4], 0 }
   0x3   :  { %14 = vsyncpa [#allocation4 + $0x1], 0  ;;  %s1068_s24 = smov 0   ;;  %s1070_s25 = smov 0  }
   0x4   :  { %s1072_s26 = smov 0   ;;  %s1074_s27 = smov 0  }
   0x5   :  { %s1076_s28 = smov 0   ;;  %s1078_s29 = smov 0  }
   0x6   :  { %s1080_s30 = smov 0   ;;  %s1082_s8 = smov 0  }
   0x7 LB: > { %1285 = sst [smem:[#allocation6_spill]] %s1013_s29  ;;  %s778_s9 = sadd.s32 4294967295, %s1021_s8   ;;  %s1021_s8 = sphi %s1082_s8, %s20_s8   ;;  %s1017_s30 = sphi %s1080_s30, %s1296_s30   ;;  %s1013_s29 = sphi %s1078_s29, %s1295_s29   ;;  %s1009_s28 = sphi %s1076_s28, %s1294_s28   ;;  %s1005_s27 = sphi %s1074_s27, %s1293_s27   ;;  %s1001_s26 = sphi %s1072_s26, %s1299_s26   ;;  %s997_s25 = sphi %s1070_s25, %s1298_s25   ;;  %s993_s24 = sphi %s1068_s24, %s1297_s24  }
   0x8   : > { %1286 = sst [smem:[#allocation7_spill]] %s1017_s30  ;;  %s779_s10 = sadd.s32 4294967294, %s1021_s8  }
   0x9   : > { %s29_s11 = sadd.s32 1, %s1013_s29  ;;  %s32_s12 = sadd.s32 1, %s1017_s30 }
   0xa   : > { %p30_p0 = scmp.ge.s32.totalorder %s29_s11, 2  ;;  %p48_p1 = scmp.ne.s32.totalorder %s1001_s26, %s997_s25 }
   0xb   : > { %p49_p2 = scmp.eq.s32.totalorder %s1021_s8, 0  ;;  %p213_p5 = scmp.eq.s32.totalorder %s778_s9, 3 }
   0xc   : > { %s1301_s11 = smov (%p30_p0, %s29_s11), 0  ;;  %s1303_s12 = smov (!%p30_p0, %s32_s12), %s1017_s30 }
   0xd   : > { %1287 = sst [smem:[#allocation8_spill]] %s1301_s11  ;;  %s37_s13 = ssub.s32 %s1013_s29, %s1301_s11 }
   0xe   : > { %p1120_p3 = por %p49_p2, %p48_p1  ;;  %p34_p4 = scmp.ge.s32.totalorder %s1303_s12, 2 }
   0xf   : > { %p218_p6 = scmp.ne.s32.totalorder %s997_s25, %s993_s24  ;;  %p219_p7 = scmp.eq.s32.totalorder %s779_s10, 3 }
  0x10   : > { %s1305_s12 = smov (%p34_p4, %s1303_s12), 0  ;;  %p1128_p8 = por %p213_p5, %p48_p1 }
  0x11   : > { %1289 = sst [smem:[#allocation9_spill]] %s1305_s12  ;;  %p1132_p9 = por %p219_p7, %p218_p6 }
  0x12   : > { %s36_s17 = ssub.s32 %s1017_s30, %s1305_s12  ;;  %s41_s19 = sadd.s32 1, %s1001_s26 }
  0x13   : > { %s38_s18 = sor.u32 %s37_s13, %s36_s17  ;;  %p781_p11 = scmp.ge.s32.totalorder %s1021_s8, 4 }
  0x14   : > { %p39_p10 = scmp.eq.s32.totalorder %s38_s18, 0 }
  0x15   : > { %250 = sbr.rel (%p781_p11) target bundleno = 39 (0x27), region = 36 }
  0x16   : > { %s1140_s20 = scalar_select %p39_p10, %s1001_s26, %s41_s19  }
  0x1c   : > { %253 = sbr.rel (!%p1120_p3) target bundleno = 39 (0x27), region = 40  ;;  %s255_s21 = sand.u32 (%p1120_p3), 1, %s1001_s26  }
  0x1d   : > { %s783_s22 = sshll.u32 (%p1120_p3), %s1017_s30, 2  ;;  %s782_s23 = sshll.u32 (%p1120_p3), %s255_s21, 3 }
  0x1e   : > { %s259_s9 = sadd.s32 (%p1120_p3), %s1013_s29, %s783_s22  ;;  %s1292_s0 = sld [smem:[#allocation10_spill]] (%p1120_p3) }
  0x1f   : > { %s784_s10 = sshll.u32 (%p1120_p3), %s259_s9, 2  ;;  %s257_s18 = scalar_lea.vmem (%p1120_p3), [#allocation2], %s782_s23 }
  0x24   : > { %s261_s17 = scalar_lea.vmem %s1292_s0, %s784_s10 }
  0x25   : > { %v277_v0 = vld [vmem:[%s261_s17] sm:$0xf]  ;;  %v279_v1 = vld [vmem:[%s261_s17 + $0x8] sm:$0xf] }
  0x26   : > { %278 = vst [vmem:[%s257_s18] sm:$0xf] %v277_v0  ;;  %280 = vst [vmem:[%s257_s18 + $0x4] sm:$0xf] %v279_v1 }
  0x27 PF: > { %p785_p12 = scmp.ge.s32.totalorder %s1021_s8, 1  ;;  %p317_p13 = scmp.lt.s32.totalorder %s1021_s8, 5 }
  0x29   : > { %p318_p0 = pnand %p785_p12, %p317_p13 }
  0x2a   : > { %p363_p1 = scmp.lt.s32.totalorder (!%p318_p0), %s1009_s28, 1  ;;  %p365_p2 = scmp.lt.s32.totalorder (!%p318_p0), %s1005_s27, 1  ;;  %v920_v2 = vld [vmem:[%s1275_s3] sm:$0xff] (!%p318_p0)   ;;  %vm394_vm0 = vcmask (!%p318_p0), 64512   ;;  %v1023_v3 = vmov (!%p318_p0), 0   ;;  %v528_v5 = vld [vmem:[%s1276_s4 + $0x10] sm:$0xff] (!%p318_p0) }
  0x2b   : > { %321 = sbr.rel (%p318_p0) target bundleno = 539 (0x21b), region = 85  ;;  %820 = vmatprep.mubr.msk.bf16.mxu0 (!%p318_p0), %vm394_vm0, %v920_v2  ;;  %s1162_s23 = sand.u32 (!%p318_p0), 1, %s997_s25   ;;  %918 = vset.pattern.permute.xlu0 (!%p318_p0), %v1023_v3  ;;  %v526_v4 = vld [vmem:[%s1276_s4] sm:$0xff] (!%p318_p0)  ;;  %v527_v6 = vld [vmem:[%s1276_s4 + $0x8] sm:$0xff] (!%p318_p0)  ;;  %v529_v7 = vld [vmem:[%s1276_s4 + $0x18] sm:$0xff] (!%p318_p0)  ;;  %vm401_vm1 = vcmask (!%p318_p0), 1043456  }
  0x2c   : > { %s786_s10 = sshll.u32 (!%p318_p0), %s1162_s23, 3  ;;  %919 = vset.pattern.permute.xlu1 (!%p318_p0), %v1023_v3  ;;  %532 = vperm.xlu0 (!%p318_p0), %918, %v526_v4   ;;  %v921_v12 = vld [vmem:[%s1275_s3 + $0x8] sm:$0xff] (!%p318_p0)   ;;  %v564_v13 = vld [vmem:[%s1278_s6] sm:$0xff] (!%p318_p0)  ;;  %vm470_vm2 = vcmask (!%p318_p0), 130048   ;;  %v566_v16 = vld [vmem:[%s1278_s6 + $0x10] sm:$0xff] (!%p318_p0)  ;;  %vm598_vm3 = vcmask (!%p318_p0), 261120  }
  0x2d   : > { %542 = vperm.xlu1 (!%p318_p0), %919, %v528_v5   ;;  %s326_s30 = scalar_lea.vmem (!%p318_p0), [#allocation2], %s786_s10  ;;  %v565_v14 = vld [vmem:[%s1278_s6 + $0x8] sm:$0xff] (!%p318_p0)  ;;  %v923_v15 = vld [vmem:[%s1274_s2] sm:$0xff] (!%p318_p0)   ;;  %v567_v17 = vld [vmem:[%s1278_s6 + $0x18] sm:$0xff] (!%p318_p0)  ;;  %s804_s10 = sshll.u32 (!%p318_p0), %s1009_s28, 3 }
  0x2e   : > { %v922_v9 = vld [vmem:[%s326_s30] sm:$0xff] (!%p318_p0)   ;;  %s787_s12 = sshll.u32 (!%p318_p0), %s1162_s23, 5  ;;  %s674_s29 = sadd.s32 (!%p318_p0), %s1005_s27, %s804_s10 }
  0x2f   : > { %v924_v18 = vld [vmem:[%s1274_s2 + $0x8] sm:$0xff] (!%p318_p0)   ;;  %v925_v19 = vld [vmem:[%s1277_s5] sm:$0xff] (!%p318_p0)   ;;  %s362_s30 = scalar_lea.vmem (!%p318_p0), [#allocation3], %s787_s12  ;;  %s1024_s13 = smov (!%p318_p0), [#allocation3]  }
  0x30   : > { %537 = vperm.xlu0 (!%p318_p0), %918, %v527_v6   ;;  %834 = vmatprep.mubr.msk.bf16.mxu1 (!%p318_p0), %vm598_vm3, %v925_v19  ;;  %v926_v38 = vld [vmem:[%s1277_s5 + $0x8] sm:$0xff] (!%p318_p0)  }
  0x31   : > { %547 = vperm.xlu1 (!%p318_p0), %919, %v529_v7  }
  0x32   : > { %s364_s19 = scalar_select %p363_p1, %s1009_s28, 1 }
  0x33   : > { %s366_s21 = scalar_select %p365_p2, %s1005_s27, 1 }
  0x34   : > { %s788_s22 = sshll.u32 %s364_s19, 1  ;;  %570 = vperm.xlu0 %918, %v564_v13  }
  0x35   : > { %s368_s9 = sadd.s32 %s788_s22, %s366_s21  ;;  %575 = vperm.xlu1 %919, %v565_v14   ;;  %s663_s21 = scalar_lea.sflag [#allocation4], %s1162_s23 }
  0x36   : > { %s789_s14 = sshll.u32 %s368_s9, 3  ;;  %s931_s9 = sshll.u32 %s1024_s13, 4  ;;  %s932_s9 = int_to_ptr.vmem [resolvable:$false] %s931_s9 }
  0x37   : > { %s370_s11 = scalar_lea.vmem %s1273_s1, %s789_s14  ;;  %s805_s14 = sshll.u32 %s674_s29, 7 }
  0x38   : > { %v374_v8 = vld [vmem:[%s370_s11] sm:$0xff]  ;;  %580 = vperm.xlu0 %918, %v566_v16   ;;  %s677_s11 = sshll.u32 %s362_s30, 4  ;;  %s1218_s19 = scalar_lea.hbm %s1279_s7, %s805_s14  ;;  %s1213_s11 = int_to_ptr.vmem [resolvable:$true] %s677_s11 }
  0x39   : > { %v375_v10 = vpack.c.bf16 %v374_v8, %v374_v8  ;;  %585 = vperm.xlu1 %919, %v567_v17   ;;  %s927_s22 = scalar_lea.vmem %s1213_s11, 512  ;;  %s933_s0 = scalar_lea.vmem %s932_s9, 1024 }
  0x3a   : > { %p928_p3 = scmp.ne.s32.totalorder %s1213_s11, %s927_s22  ;;  %p934_p6 = scmp.lt.s32.totalorder %s1213_s11, %s932_s9 }
  0x3b   : > { %842 = vmatprep.subr.msk.bf16.mxu0 %vm401_vm1, %v375_v10  ;;  %v403_v11 = vsel %vm401_vm1, %v375_v10, 0  ;;  %p935_p7 = scmp.lt.s32.totalorder %s933_s0, %s927_s22 }
  0x3c   : > { %819 = vmatpush3.bf16.msra.mxu0 %v403_v11  ;;  %p929_p4 = pnand %p928_p3, %p1128_p8 }
  0x3d   : > { %824 = vmatprep.subr.bf16.mxu0 %v922_v9  ;;  %p936_p10 = por %p935_p7, %p934_p6 }
  0x3e   : > { %p930_p5 = pneg %p929_p4 }
  0x3f   : > { %821 = vmatmul.mubr.msk.bf16.vlgmr.msra.gmra.mrb[0].mxu0 %vm394_vm0, %v921_v12 }
  0x40   : > { %825 = vmatpush3.bf16.msra.mxu0 %v922_v9  ;;  %826 = vmatprep.mubr.msk.bf16.mxu0 %vm470_vm2, %v923_v15  ;;  %p937_p11 = pnand %p936_p10, %p930_p5 }
  0x4b   : > { %827 = vmatmul.mubr.msk.bf16.vlgmr.msra.gmra.mrb[0].mxu0 %vm470_vm2, %v924_v18 }
  0xab   : > { %v533_v21 = vpop.permute.xlu0 %532 }
  0xac   : > { %v543_v20 = vpop.permute.xlu1 %542 }
  0xaf   : > { %v538_v28 = vpop.permute.xlu0 %537 }
  0xb0   : > { %v548_v25 = vpop.permute.xlu1 %547 }
  0xb3   : > { %v571_v39 = vpop.permute.xlu0 %570 }
  0xb4   : > { %v576_v40 = vpop.permute.xlu1 %575 }
  0xb7   : > { %v581_v41 = vpop.permute.xlu0 %580 }
  0xb8   : > { %v586_v45 = vpop.permute.xlu1 %585 }
 0x11e   : > { %v828_v22 = vpop.f32.mrb[0].mxu0 }
 0x11f   : > { %v552_v23 = vadd.f32 %v828_v22, %v543_v20  ;;  %v511_v24 = vpop.f32.mrb[1].mxu0 }
 0x120   : > { %v550_v26 = vadd.f32 %v533_v21, %v511_v24  ;;  %v829_v27 = vpop.f32.mrb[2].mxu0 }
 0x121   : > { %v553_v29 = vadd.f32 %v829_v27, %v548_v25  ;;  %v514_v30 = vpop.f32.mrb[3].mxu0  ;;  %v556_v32 = vmax.f32 %v552_v23, 0.0 }
 0x122   : > { %v551_v31 = vadd.f32 %v538_v28, %v514_v30  ;;  %v554_v34 = vmax.f32 %v550_v26, 0.0 }
 0x123   : > { %v557_v33 = vmax.f32 %v553_v29, 0.0 }
 0x124   : > { %v555_v35 = vmax.f32 %v551_v31, 0.0 }
 0x125   : > { %v559_v36 = vpack.c.bf16 %v557_v33, %v556_v32 }
 0x126   : > { %v558_v37 = vpack.c.bf16 %v555_v35, %v554_v34 }
 0x128   : > { %830 = vmatprep.subr.bf16.mxu1 %v558_v37 }
 0x129   : > { %831 = vmatpush3.bf16.msra.mxu1 %v558_v37 }
 0x12a   : > { %832 = vmatprep.subr.bf16.mxu1 %v559_v36 }
 0x12d   : > { %833 = vmatpush3.bf16.msra.mxu1 %v559_v36 }
 0x130   : > { %835 = vmatmul.mubr.msk.bf16.vlgmr.msra.gmra.mrb[0].mxu1 %vm598_vm3, %v926_v38 }
 0x203   : > { %v836_v42 = vpop.f32.mrb[0].mxu1 }
 0x204   : > { %v648_v43 = vadd.f32 %v836_v42, %v581_v41  ;;  %v639_v44 = vpop.f32.mrb[1].mxu1 }
 0x205   : > { %v640_v46 = vadd.f32 %v639_v44, %v571_v39  ;;  %v837_v47 = vpop.f32.mrb[2].mxu1 }
 0x206   : > { %v656_v48 = vmax.f32 %v648_v43, 0.0  ;;  %v651_v49 = vadd.f32 %v837_v47, %v586_v45  ;;  %v642_v50 = vpop.f32.mrb[3].mxu1 }
 0x207   : > { %v654_v51 = vmax.f32 %v640_v46, 0.0  ;;  %v643_v52 = vadd.f32 %v642_v50, %v576_v40 }
 0x208   : > { %660 = vst [vmem:[%s362_s30 + $0x10] sm:$0xff] %v656_v48  ;;  %v657_v53 = vmax.f32 %v651_v49, 0.0 }
 0x209   : > { %658 = vst [vmem:[%s362_s30] sm:$0xff] %v654_v51  ;;  %v655_v54 = vmax.f32 %v643_v52, 0.0 }
 0x20a   : > { %661 = vst [vmem:[%s362_s30 + $0x18] sm:$0xff] %v657_v53 }
 0x20b   : > { %659 = vst [vmem:[%s362_s30 + $0x8] sm:$0xff] %v655_v54 }
 0x20c   : > { %940 = shalt.err (!%p937_p11)
}
 0x20d   : > { %s941_s17 = scalar_lea.hbm %s1218_s19, 512  ;;  %s945_s12 = scalar_lea.hbm %s1279_s7, 2048 }
 0x20e   : > { %p942_p12 = scmp.ne.s32.totalorder %s1218_s19, %s941_s17  ;;  %p946_p1 = scmp.lt.u32.totalorder %s1218_s19, %s1279_s7 }
 0x20f   : > { %p947_p2 = scmp.lt.u32.totalorder %s945_s12, %s941_s17  ;;  %p949_p4 = scmp.lt.u32.totalorder %s941_s17, %s1218_s19 }
 0x210   : > { %p943_p13 = pnand %p942_p12, %p1128_p8 }
 0x211   : > { %p948_p3 = por %p947_p2, %p946_p1 }
 0x212   : > { %p944_p0 = pneg %p943_p13 }
 0x213   : > { %p950_p5 = por %p949_p4, %p948_p3 }
 0x215   : > { %p951_p6 = pnand %p950_p5, %p944_p0 }
 0x217   : > { %954 = shalt.err (!%p951_p6)
}
 0x218   : > { %s1025_s14 = smov 128   ;;  %s1026_s27 = smov 256  }
 0x219   : > { %s1027_s28 = smov 8  }
 0x21a   : > { %843 = dma.vmem_to_hbm [thread:$0]  (%p1128_p8), %s1213_s11, 512, %s1218_s19, %s663_s21, %s1025_s14, %s1026_s27, %s1027_s28  }
 0x21b PF: > { %p849_p7 = scmp.ge.s32.totalorder %s1021_s8, 2  ;;  %s692_s22 = sand.u32 1, %s993_s24  }
 0x21c   : > { %s693_s13 = scalar_lea.sflag [#allocation4], %s692_s22 }
 0x21d   : > { %p846_p10 = pnand %p849_p7, %p1132_p9 }
 0x21f   : > { %988 = dma.done.wait (!%p846_p10), %s693_s13, 512  }
 0x220   : > { %990 = vsyncadd (!%p846_p10), %s693_s13, 4294966784  ;;  %s20_s8 = sadd.s32 1, %s1021_s8   ;;  %s1293_s27 = sld [smem:[#allocation6_spill]] }
 0x221   : > { %p17_p11 = scmp.ge.s32.totalorder %s20_s8, 6   ;;  %s1294_s28 = sld [smem:[#allocation7_spill]] }
 0x222   : > { %s1295_s29 = sld [smem:[#allocation8_spill]]  ;;  %s1296_s30 = sld [smem:[#allocation9_spill]] }
 0x223   : > { %s1297_s24 = smov %s997_s25  ;;  %s1298_s25 = smov %s1001_s26 }
 0x224   : > { %s1299_s26 = smov %s1140_s20  ;;  %19 = sbr.rel (!%p17_p11) target bundleno = 7 (0x7), region = 132 }
 0x22b   :  { %698 = vsyncpa [#allocation4], 1 }
 0x22c   :  { %700 = vsyncpa [#allocation4 + $0x1], 1 }

</bundles_post_ra>
